<compile_context>
chip_gen: v7x
topology: tpu7x:2x2x1
jax: 0.10.0
libtpu: 0.0.40
codegen_flags: <defaults>
</compile_context>

<pallas_src>
import functools

import jax
import jax.numpy as jnp
from jax.experimental import pallas as pl
from jax.experimental.pallas import tpu as pltpu

_LANE = 128
_MIN_TILE_BYTES = 1 << 20          # keep x tiles >= ~1 MiB (step overhead << 1%)
_TARGET_GRID_STEPS = 8             # amortize pipeline prologue / epilogue


def _vmem_capacity_bytes():
    """Physical VMEM per TensorCore; conservative 64 MiB if the query fails."""
    try:
        cap = getattr(pltpu.get_tpu_info(), "vmem_capacity_bytes", None)
        if cap:
            return int(cap)
    except Exception:
        pass
    return 64 * 1024 * 1024


def _budgets(vmem_cap):
    """(per-x-tile budget, vmem_limit_bytes) derived from physical VMEM."""
    if vmem_cap >= 96 * 1024 * 1024:       # 128 MiB parts: v5e / v6e
        tile, limit = 16 * 1024 * 1024, 96 * 1024 * 1024
    else:                                   # 64 MiB parts: v7x
        tile, limit = 10 * 1024 * 1024, 56 * 1024 * 1024
    limit = min(limit, (vmem_cap * 7) // 8)
    tile = min(tile, max(1 << 20, limit // 6))   # 2x(in+out) tiles + headroom
    return tile, limit


def _choose_bt(batch, per_image_bytes, tile_budget_bytes):
    """Batch-tile: fits budget, >= ~8 grid steps, >= ~1 MiB tiles, even steps."""
    bt_budget = max(1, min(batch, tile_budget_bytes // per_image_bytes))
    bt_floor = min(bt_budget, max(1, pl.cdiv(_MIN_TILE_BYTES, per_image_bytes)))
    bt_depth = max(1, pl.cdiv(batch, _TARGET_GRID_STEPS))
    bt = min(bt_budget, max(bt_depth, bt_floor))

    def steps(b):
        return pl.cdiv(batch, b)

    # v7x has 2 TensorCores: prefer an even number of grid steps (best effort,
    # never shrinking the tile by more than ~2x).
    if steps(bt) > 1 and steps(bt) % 2 == 1:
        for cand in range(bt - 1, max(0, bt // 2 - 1), -1):
            if steps(cand) % 2 == 0:
                bt = cand
                break
    return bt


def _se_fused_kernel(x_ref, w1t_ref, b1_ref, w2t_ref, b2_ref, o_ref, *, inv_hw):
    """Single pass: pool + MLP + scale on a (Bt, C, HW) block."""
    x = x_ref[...]
    # AdaptiveAvgPool2d(1): f32 accumulation over the lane (HW) axis.
    pooled = jnp.sum(x, axis=-1, dtype=jnp.float32) * inv_hw            # (Bt, C)
    # Linear(C -> hidden) + ReLU (weights pre-transposed to (C, hidden)).
    h = jnp.dot(pooled, w1t_ref[...], preferred_element_type=jnp.float32)
    h = jnp.maximum(h + b1_ref[...], 0.0)                               # (Bt, hidden)
    # Linear(hidden -> C) + Sigmoid.
    s = jnp.dot(h, w2t_ref[...], preferred_element_type=jnp.float32)
    s = jax.nn.sigmoid(s + b2_ref[...])                                 # (Bt, C)
    # Scale in the input dtype (no second f32 copy of the big tile).
    o_ref[...] = x * s.astype(x.dtype)[:, :, None]


def _se_pool_mlp_kernel(x_ref, w1t_ref, b1_ref, w2t_ref, b2_ref, s_ref, acc_ref,
                        *, hw, thw, inv_hw):
    """Two-pass fallback, pass 1: masked pooling over HW chunks, then tiny MLP."""
    hc = pl.program_id(1)

    @pl.when(hc == 0)
    def _():
        acc_ref[...] = jnp.zeros_like(acc_ref)

    x = x_ref[...]                                                      # (1, C, Thw)
    # Mask lanes beyond the true spatial extent (ragged last HW chunk holds
    # unspecified data -- it must NOT leak into the pooled sum).
    lane = jax.lax.broadcasted_iota(jnp.int32, x.shape, dimension=2)
    valid = (lane + hc * thw) < hw
    acc_ref[...] += jnp.sum(jnp.where(valid, x.astype(jnp.float32), 0.0), axis=-1)

    @pl.when(hc == pl.num_programs(1) - 1)
    def _():
        pooled = acc_ref[...] * inv_hw                                  # (1, C)
        h = jnp.dot(pooled, w1t_ref[...], preferred_element_type=jnp.float32)
        h = jnp.maximum(h + b1_ref[...], 0.0)
        s = jnp.dot(h, w2t_ref[...], preferred_element_type=jnp.float32)
        s_ref[...] = jax.nn.sigmoid(s + b2_ref[...]).astype(s_ref.dtype)


def _se_scale_kernel(x_ref, s_ref, o_ref):
    """Two-pass fallback, pass 2: out = x * s (broadcast over the HW chunk)."""
    o_ref[...] = x_ref[...] * s_ref[...][:, :, None]


def se_block(x, w1, b1, w2, b2, *, tile_budget_bytes=None, vmem_limit_bytes=None):
    """SEBlock forward.

    x: (B, C, H, W); w1: (hidden, C); b1: (hidden,); w2: (C, hidden); b2: (C,).
    """
    B, C, H, W = x.shape
    hidden = w1.shape[0]
    HW = H * W
    itemsize = jnp.dtype(x.dtype).itemsize

    vmem_cap = _vmem_capacity_bytes()
    auto_tile, auto_limit = _budgets(vmem_cap)
    tile_budget_bytes = auto_tile if tile_budget_bytes is None else tile_budget_bytes
    vmem_limit_bytes = auto_limit if vmem_limit_bytes is None else vmem_limit_bytes

    # PyTorch Linear weights are (out, in); pre-transpose so the kernel does no
    # in-kernel transposes.  Biases become broadcastable rows.
    w1t = jnp.asarray(w1).T                      # (C, hidden)
    w2t = jnp.asarray(w2).T                      # (hidden, C)
    b1r = jnp.asarray(b1).reshape(1, hidden)
    b2r = jnp.asarray(b2).reshape(1, C)
    weight_bytes = (w1t.size * w1t.dtype.itemsize + w2t.size * w2t.dtype.itemsize
                    + b1r.size * b1r.dtype.itemsize + b2r.size * b2r.dtype.itemsize)

    x_flat = x.reshape(B, C, HW)                 # contiguous reshape: free
    per_image_bytes = C * HW * itemsize
    inv_hw = 1.0 / HW

    if per_image_bytes <= tile_budget_bytes:
        # ------- Single fused pass: whole (C, HW) images per grid step. -------
        bt = _choose_bt(B, per_image_bytes, tile_budget_bytes)
        grid = (pl.cdiv(B, bt),)

        cost = pl.CostEstimate(
            flops=2 * B * C * HW + 4 * B * C * hidden,
            transcendentals=B * C,
            bytes_accessed=2 * B * C * HW * itemsize + weight_bytes,
        )
        out_flat = pl.pallas_call(
            functools.partial(_se_fused_kernel, inv_hw=inv_hw),
            out_shape=jax.ShapeDtypeStruct((B, C, HW), x.dtype),
            grid_spec=pltpu.PrefetchScalarGridSpec(
                num_scalar_prefetch=0,
                grid=grid,
                in_specs=[
                    # Full (C, HW) extent in the last two dims -> no padding
                    # needed; only the batch axis may be ragged (masked writes).
                    pl.BlockSpec((bt, C, HW), lambda b: (b, 0, 0)),
                    pl.BlockSpec((C, hidden), lambda b: (0, 0)),   # W1^T resident
                    pl.BlockSpec((1, hidden), lambda b: (0, 0)),   # b1
                    pl.BlockSpec((hidden, C), lambda b: (0, 0)),   # W2^T resident
                    pl.BlockSpec((1, C), lambda b: (0, 0)),        # b2
                ],
                out_specs=pl.BlockSpec((bt, C, HW), lambda b: (b, 0, 0)),
            ),
            compiler_params=pltpu.CompilerParams(
                dimension_semantics=("parallel",),
                vmem_limit_bytes=vmem_limit_bytes,
            ),
            cost_estimate=cost,
        )(x_flat, w1t, b1r, w2t, b2r)
        return out_flat.reshape(B, C, H, W)

    # ---- Two-pass fallback: one (C, HW) image exceeds the tile budget. ----
    # Pass 1: pool (+ tiny MLP) tiled over 128-aligned HW chunks.
    # Pass 2: broadcast-multiply tiled over the same chunks.
    thw = max(_LANE, (tile_budget_bytes // (C * itemsize)) // _LANE * _LANE)
    thw = min(thw, pl.cdiv(HW, _LANE) * _LANE)
    n_hw = pl.cdiv(HW, thw)

    pool_cost = pl.CostEstimate(
        flops=B * C * HW + 4 * B * C * hidden,
        transcendentals=B * C,
        bytes_accessed=B * C * HW * itemsize + B * C * itemsize + weight_bytes,
    )
    s = pl.pallas_call(
        functools.partial(_se_pool_mlp_kernel, hw=HW, thw=thw, inv_hw=inv_hw),
        out_shape=jax.ShapeDtypeStruct((B, C), x.dtype),
        grid_spec=pltpu.PrefetchScalarGridSpec(
            num_scalar_prefetch=0,
            grid=(B, n_hw),
            in_specs=[
                pl.BlockSpec((1, C, thw), lambda b, h: (b, 0, h)),
                pl.BlockSpec((C, hidden), lambda b, h: (0, 0)),
                pl.BlockSpec((1, hidden), lambda b, h: (0, 0)),
                pl.BlockSpec((hidden, C), lambda b, h: (0, 0)),
                pl.BlockSpec((1, C), lambda b, h: (0, 0)),
            ],
            out_specs=pl.BlockSpec((1, C), lambda b, h: (b, 0)),
            scratch_shapes=[pltpu.VMEM((1, C), jnp.float32)],
        ),
        compiler_params=pltpu.CompilerParams(
            dimension_semantics=("parallel", "arbitrary"),
            vmem_limit_bytes=vmem_limit_bytes,
        ),
        cost_estimate=pool_cost,
    )(x_flat, w1t, b1r, w2t, b2r)

    scale_cost = pl.CostEstimate(
        flops=B * C * HW,
        transcendentals=0,
        bytes_accessed=2 * B * C * HW * itemsize + B * C * itemsize,
    )
    out_flat = pl.pallas_call(
        _se_scale_kernel,
        out_shape=jax.ShapeDtypeStruct((B, C, HW), x.dtype),
        grid_spec=pltpu.PrefetchScalarGridSpec(
            num_scalar_prefetch=0,
            grid=(B, n_hw),
            in_specs=[
                pl.BlockSpec((1, C, thw), lambda b, h: (b, 0, h)),
                pl.BlockSpec((1, C), lambda b, h: (b, 0)),
            ],
            out_specs=pl.BlockSpec((1, C, thw), lambda b, h: (b, 0, h)),
        ),
        compiler_params=pltpu.CompilerParams(
            dimension_semantics=("parallel", "parallel"),
            vmem_limit_bytes=vmem_limit_bytes,
        ),
        cost_estimate=scale_cost,
    )(x_flat, s)
    return out_flat.reshape(B, C, H, W)


def _reference(x, w1, b1, w2, b2):
    pooled = jnp.mean(x, axis=(2, 3))                       # (B, C)
    h = jnp.maximum(pooled @ w1.T + b1, 0.0)                # (B, hidden)
    s = jax.nn.sigmoid(h @ w2.T + b2)                       # (B, C)
    return x * s[:, :, None, None]


if __name__ == "__main__":
    key = jax.random.PRNGKey(0)
    kx, kx2, k1, k2, k3, k4 = jax.random.split(key, 6)

    C = 32
    reduction = 16
    hidden = C // reduction  # = 2

    # PyTorch Linear layout: (out_features, in_features).
    w1 = jax.random.normal(k1, (hidden, C), dtype=jnp.float32) * 0.1
    b1 = jax.random.normal(k2, (hidden,), dtype=jnp.float32) * 0.1
    w2 = jax.random.normal(k3, (C, hidden), dtype=jnp.float32) * 0.1
    b2 = jax.random.normal(k4, (C,), dtype=jnp.float32) * 0.1

    # 1) Fused single-pass path with default (hardware-derived) budgets.
    x = jax.random.normal(kx, (2, C, 16, 16), dtype=jnp.float32)
    out = jax.block_until_ready(se_block(x, w1, b1, w2, b2))
    ref = _reference(x, w1, b1, w2, b2)
    assert out.shape == x.shape
    assert jnp.allclose(out, ref, atol=1e-5, rtol=1e-5), "fused path mismatch"

    # 2) Fused path with a ragged batch tile (Bt=2 over B=3) and a non-128
    #    spatial extent (15x15): exercises masked batch-edge writes.
    x2 = jax.random.normal(kx2, (3, C, 15, 15), dtype=jnp.float32)
    ref2 = _reference(x2, w1, b1, w2, b2)
    out2 = jax.block_until_ready(
        se_block(x2, w1, b1, w2, b2, tile_budget_bytes=64 * 1024))
    assert jnp.allclose(out2, ref2, atol=1e-5, rtol=1e-5), "ragged-batch mismatch"

    # 3) Two-pass large-image fallback (forced via a tiny tile budget):
    #    exercises the masked ragged HW tail (225 % 128 != 0).
    out3 = jax.block_until_ready(
        se_block(x2, w1, b1, w2, b2, tile_budget_bytes=16 * 1024))
    assert jnp.allclose(out3, ref2, atol=1e-5, rtol=1e-5), "two-pass mismatch"

    print("KERNEL_OK")
</pallas_src>

<mosaic_0001>
module attributes {stable_mosaic.version = 11 : i64} {
  func.func @_se_fused_kernel(%arg0: i32, %arg1: memref<2x32x256xf32, #tpu.memory_space<vmem>>, %arg2: memref<32x2xf32, #tpu.memory_space<vmem>>, %arg3: memref<1x2xf32, #tpu.memory_space<vmem>>, %arg4: memref<2x32xf32, #tpu.memory_space<vmem>>, %arg5: memref<1x32xf32, #tpu.memory_space<vmem>>, %arg6: memref<2x32x256xf32, #tpu.memory_space<vmem>>) attributes {dimension_semantics = [#tpu.dimension_semantics<parallel>], iteration_bounds = array<i64: 1>, scalar_prefetch = 0 : i64, scratch_operands = 0 : i64, tpu.core_type = #tpu.core_type<tc>, window_params = [{transform_indices = @transform_0, window_bounds = array<i64: 2, 32, 256>}, {pipeline_mode = #tpu.pipeline_mode<synchronous>, transform_indices = @transform_1, window_bounds = array<i64: 32, 2>}, {pipeline_mode = #tpu.pipeline_mode<synchronous>, transform_indices = @transform_2, window_bounds = array<i64: 1, 2>}, {pipeline_mode = #tpu.pipeline_mode<synchronous>, transform_indices = @transform_3, window_bounds = array<i64: 2, 32>}, {pipeline_mode = #tpu.pipeline_mode<synchronous>, transform_indices = @transform_4, window_bounds = array<i64: 1, 32>}, {transform_indices = @transform_5, window_bounds = array<i64: 2, 32, 256>}]} {
    %c0 = arith.constant 0 : index
    %c0_0 = arith.constant 0 : index
    %c0_1 = arith.constant 0 : index
    %0 = vector.load %arg1[%c0, %c0_0, %c0_1] : memref<2x32x256xf32, #tpu.memory_space<vmem>>, vector<2x32x256xf32>
    %cst = arith.constant dense<0.000000e+00> : vector<2x32xf32>
    %1 = vector.multi_reduction <add>, %0, %cst [2] : vector<2x32x256xf32> to vector<2x32xf32>
    %cst_2 = arith.constant 3.906250e-03 : f32
    %2 = vector.broadcast %cst_2 : f32 to vector<2x32xf32>
    %3 = arith.mulf %1, %2 : vector<2x32xf32>
    %c0_3 = arith.constant 0 : index
    %c0_4 = arith.constant 0 : index
    %4 = vector.load %arg2[%c0_3, %c0_4] : memref<32x2xf32, #tpu.memory_space<vmem>>, vector<32x2xf32>
    %cst_5 = arith.constant dense<0.000000e+00> : vector<2x2xf32>
    %5 = tpu.matmul %3, %4, %cst_5 {dimension_numbers = #tpu.dot_dimension_numbers<[1], [0], [0], [1], [0, 0, 1, 1], [], []>} : vector<2x32xf32>, vector<32x2xf32>, vector<2x2xf32> -> vector<2x2xf32>
    %c0_6 = arith.constant 0 : index
    %c0_7 = arith.constant 0 : index
    %6 = vector.load %arg3[%c0_6, %c0_7] : memref<1x2xf32, #tpu.memory_space<vmem>>, vector<1x2xf32>
    %7 = vector.broadcast %6 : vector<1x2xf32> to vector<2x2xf32>
    %8 = arith.addf %5, %7 : vector<2x2xf32>
    %cst_8 = arith.constant 0.000000e+00 : f32
    %9 = vector.broadcast %cst_8 : f32 to vector<2x2xf32>
    %10 = arith.maximumf %8, %9 : vector<2x2xf32>
    %c0_9 = arith.constant 0 : index
    %c0_10 = arith.constant 0 : index
    %11 = vector.load %arg4[%c0_9, %c0_10] : memref<2x32xf32, #tpu.memory_space<vmem>>, vector<2x32xf32>
    %cst_11 = arith.constant dense<0.000000e+00> : vector<2x32xf32>
    %12 = tpu.matmul %10, %11, %cst_11 {dimension_numbers = #tpu.dot_dimension_numbers<[1], [0], [0], [1], [0, 0, 1, 1], [], []>} : vector<2x2xf32>, vector<2x32xf32>, vector<2x32xf32> -> vector<2x32xf32>
    %c0_12 = arith.constant 0 : index
    %c0_13 = arith.constant 0 : index
    %13 = vector.load %arg5[%c0_12, %c0_13] : memref<1x32xf32, #tpu.memory_space<vmem>>, vector<1x32xf32>
    %14 = vector.broadcast %13 : vector<1x32xf32> to vector<2x32xf32>
    %15 = arith.addf %12, %14 : vector<2x32xf32>
    %16 = arith.negf %15 : vector<2x32xf32>
    %17 = math.exp %16 : vector<2x32xf32>
    %cst_14 = arith.constant 1.000000e+00 : f32
    %18 = vector.broadcast %cst_14 : f32 to vector<2x32xf32>
    %19 = arith.addf %18, %17 : vector<2x32xf32>
    %20 = arith.divf %18, %19 : vector<2x32xf32>
    %21 = vector.shape_cast %20 : vector<2x32xf32> to vector<2x32x1xf32>
    %22 = vector.broadcast %21 : vector<2x32x1xf32> to vector<2x32x256xf32>
    %23 = arith.mulf %0, %22 : vector<2x32x256xf32>
    %c0_15 = arith.constant 0 : index
    %c0_16 = arith.constant 0 : index
    %c0_17 = arith.constant 0 : index
    %24 = vector.load %arg6[%c0_15, %c0_16, %c0_17] : memref<2x32x256xf32, #tpu.memory_space<vmem>>, vector<2x32x256xf32>
    tpu.vector_store %arg6[%c0_15, %c0_16, %c0_17], %23 {strides = array<i32>} : memref<2x32x256xf32, #tpu.memory_space<vmem>>, vector<2x32x256xf32>,
    return
  }
  func.func @transform_0(%arg0: i32) -> (i32, i32, i32) {
    %c0_i32 = arith.constant 0 : i32
    %c0_i32_0 = arith.constant 0 : i32
    %c0_i32_1 = arith.constant 0 : i32
    return %arg0, %c0_i32, %c0_i32_0 : i32, i32, i32
  }
  func.func @transform_1(%arg0: i32) -> (i32, i32) {
    %c0_i32 = arith.constant 0 : i32
    %c0_i32_0 = arith.constant 0 : i32
    %c0_i32_1 = arith.constant 0 : i32
    return %c0_i32, %c0_i32_0 : i32, i32
  }
  func.func @transform_2(%arg0: i32) -> (i32, i32) {
    %c0_i32 = arith.constant 0 : i32
    %c0_i32_0 = arith.constant 0 : i32
    %c0_i32_1 = arith.constant 0 : i32
    return %c0_i32, %c0_i32_0 : i32, i32
  }
  func.func @transform_3(%arg0: i32) -> (i32, i32) {
    %c0_i32 = arith.constant 0 : i32
    %c0_i32_0 = arith.constant 0 : i32
    %c0_i32_1 = arith.constant 0 : i32
    return %c0_i32, %c0_i32_0 : i32, i32
  }
  func.func @transform_4(%arg0: i32) -> (i32, i32) {
    %c0_i32 = arith.constant 0 : i32
    %c0_i32_0 = arith.constant 0 : i32
    %c0_i32_1 = arith.constant 0 : i32
    return %c0_i32, %c0_i32_0 : i32, i32
  }
  func.func @transform_5(%arg0: i32) -> (i32, i32, i32) {
    %c0_i32 = arith.constant 0 : i32
    %c0_i32_0 = arith.constant 0 : i32
    %c0_i32_1 = arith.constant 0 : i32
    return %arg0, %c0_i32, %c0_i32_0 : i32, i32, i32
  }
}

</mosaic_0001>

<bundles_post_ra>
// kernel: tpu_custom_call.1
= control target key start
LH: loop header
LB: loop body
LE: loop exit
PB: predicated region body
PF: predicated region fallthrough
CT: control target
= control target key end

     0   :  { %10 = vsyncpa [#allocation3], 0  ;;  %s657_s0 = inlined_call_operand.hbm [shape: f32[2,32,256], index: 0, kind: input, shape index: {}]   ;;  %s658_s1 = inlined_call_operand.vmem [shape: f32[32,2], index: 1, kind: input, shape index: {}]   ;;  %s659_s2 = inlined_call_operand.vmem [shape: f32[1,2], index: 2, kind: input, shape index: {}]   ;;  %s660_s3 = inlined_call_operand.vmem [shape: f32[2,32], index: 3, kind: input, shape index: {}]   ;;  %s661_s4 = inlined_call_operand.vmem [shape: f32[1,32], index: 4, kind: input, shape index: {}]   ;;  %s662_s5 = inlined_call_operand.hbm [shape: f32[2,32,256], index: 5, kind: output, shape index: {}]  }
   0x1   :  { %11 = vsyncpa [#allocation4], 0  ;;  %s497_s18 = smov [#allocation2]   ;;  %s449_s22 = scalar_lea.hbm %s657_s0, 2048 }
   0x2   :  { %s17_s19 = sshll.u32 %s497_s18, 4  ;;  %p450_p0 = scmp.ne.s32.totalorder %s657_s0, %s449_s22  ;;  %s18_s19 = int_to_ptr.vmem [resolvable:$true] %s17_s19 }
   0x3   :  { %p453_p1 = scmp.lt.u32.totalorder %s449_s22, %s657_s0 }
   0x5   :  { %p455_p2 = pnand %p453_p1, %p450_p0 }
   0x7   :  { %458 = shalt.err (!%p455_p2)
}
   0x8   :  { %s459_s27 = scalar_lea.vmem %s18_s19, 2048  ;;  %p464_p4 = scmp.lt.s32.totalorder %s18_s19, %s18_s19 }
   0x9   :  { %p460_p3 = scmp.ne.s32.totalorder %s18_s19, %s459_s27  ;;  %p465_p5 = scmp.lt.s32.totalorder %s459_s27, %s459_s27 }
   0xb   :  { %p466_p6 = por %p465_p5, %p464_p4 }
   0xd   :  { %p467_p7 = pnand %p466_p6, %p460_p3 }
   0xf   :  { %470 = shalt.err (!%p467_p7)
}
  0x10   :  { %s498_s28 = smov 256   ;;  %s499_s29 = smov 16  }
  0x11   :  { %23 = dma.hbm_to_vmem [thread:$0]  %s657_s0, 2048, %s18_s19, [#allocation3], %s498_s28, %s498_s28, %s499_s29  }
  0x12   :  { %493 = dma.done.wait [#allocation3], 2048  }
  0x13   :  { %494 = vsyncadd [#allocation3], 4294965248  ;;  %v549_v0 = vld [vmem:[#allocation2 + $0x40] sm:$0xff]  ;;  %v551_v1 = vld [vmem:[#allocation2 + $0x48] sm:$0xff]  ;;  %v500_v27 = vmov 0.0|0.0   ;;  %vm501_vm0 = vmmov 0   ;;  %v102_v32 = vlaneseq }
  0x14   :  { %v553_v2 = vld [vmem:[#allocation2] sm:$0xff]  ;;  %v63_v3 = vadd.f32 %v551_v1, %v549_v0  ;;  %v557_v4 = vld [vmem:[#allocation2 + $0x8] sm:$0xff]  ;;  %v559_v5 = vld [vmem:[#allocation2 + $0x50] sm:$0xff]  ;;  %432 = vmatprep.subr.bf16.mxu0 %v500_v27  ;;  %v502_v31 = vmov 0.0   ;;  %vm113_vm1 = vcmask 130112   ;;  %vm120_vm2 = vcmask 195712  }
  0x15   :  { %v561_v6 = vld [vmem:[#allocation2 + $0x58] sm:$0xff]  ;;  %v51_v7 = vadd.f32 %v557_v4, %v553_v2  ;;  %v565_v8 = vld [vmem:[#allocation2 + $0x10] sm:$0xff]  ;;  %v573_v12 = vld [vmem:[#allocation2 + $0x60] sm:$0xff]  ;;  %424 = vmatprep.mubr.msk.f32.mxu0 %vm501_vm0, %v502_v31  ;;  %427 = vmatprep.subr.mxu1 %v502_v31  ;;  %v103_v34 = vand.u32 127, %v102_v32  ;;  %v609_v39 = vshrl.u32 %v102_v32, 7  ;;  %vm127_vm3 = vcmask 261312  }
  0x16   :  { %v567_v9 = vld [vmem:[#allocation2 + $0x18] sm:$0xff]  ;;  %64 = vadd.xlane.f32.xlu1 %v63_v3  ;;  %v66_v10 = vadd.f32 %v561_v6, %v559_v5  ;;  %v575_v13 = vld [vmem:[#allocation2 + $0x68] sm:$0xff]  ;;  %v577_v14 = vld [vmem:[#allocation2 + $0x20] sm:$0xff]  ;;  %429 = vmatprep.mubr.msk.f32.mxu1 %vm501_vm0, %v502_v31  ;;  %vm148_vm4 = vcmask 1041409   ;;  %vm150_vm5 = vcmask 261120   ;;  %vm236_vm6 = vcmask 1041408  }
  0x17   :  { %52 = vadd.xlane.f32.xlu0 %v51_v7  ;;  %v54_v11 = vadd.f32 %v567_v9, %v565_v8  ;;  %v579_v15 = vld [vmem:[#allocation2 + $0x28] sm:$0xff]  ;;  %v69_v16 = vadd.f32 %v575_v13, %v573_v12  ;;  %v585_v18 = vld [vmem:[#allocation2 + $0x70] sm:$0xff]  ;;  %v587_v19 = vld [vmem:[#allocation2 + $0x78] sm:$0xff]  ;;  %v108_v36 = vadd.s32 4294967288, %v103_v34  ;;  %v115_v38 = vadd.s32 4294967280, %v103_v34 }
  0x18   :  { %v57_v17 = vadd.f32 %v579_v15, %v577_v14  ;;  %v589_v20 = vld [vmem:[#allocation2 + $0x30] sm:$0xff]  ;;  %v591_v21 = vld [vmem:[#allocation2 + $0x38] sm:$0xff]  ;;  %v72_v22 = vadd.f32 %v587_v19, %v585_v18  ;;  %v83_v24 = vld [vmem:[%s658_s1] sm:$0xff]  ;;  %v122_v43 = vadd.s32 4294967272, %v103_v34  ;;  %v106_v47 = vsub.s32 %v103_v34, %v609_v39 }
  0x19   :  { %v60_v23 = vadd.f32 %v591_v21, %v589_v20  ;;  %v84_v25 = vld [vmem:[%s658_s1 + $0x8] sm:$0xff]  ;;  %v85_v28 = vld [vmem:[%s658_s1 + $0x10] sm:$0xff]  ;;  %v86_v29 = vld [vmem:[%s658_s1 + $0x18] sm:$0xff]  ;;  %v111_v41 = vsub.s32 %v108_v36, %v609_v39  ;;  %v118_v45 = vsub.s32 %v115_v38, %v609_v39  ;;  %vm232_vm7 = vcmask 15360  }
  0x1a   :  { %67 = vadd.xlane.f32.xlu1 %v66_v10  ;;  %v433_v26 = vpack.c.bf16 %v84_v25, %v83_v24  ;;  %v436_v30 = vpack.c.bf16 %v86_v29, %v85_v28  ;;  %v125_v54 = vsub.s32 %v122_v43, %v609_v39  ;;  %v224_v25 = vld [vmem:[%s660_s3] sm:$0x3]  ;;  %v318_v38 = vsub.s32 0, %v609_v39 }
  0x1b   :  { %55 = vadd.xlane.f32.xlu0 %v54_v11  ;;  %428 = vmatpush3.msk.msra.mxu1 %vm236_vm6, %v224_v25  ;;  %v405_v31 = vld [vmem:[%s661_s4] ss:$0 sm:$0xff] }
  0x1c   :  { %434 = vmatpush3.bf16.msra.mxu0 %v433_v26  ;;  %v403_v26 = vld [vmem:[%s659_s2] ss:$0 sm:$0xff]  ;;  %s503_s2 = smov [#allocation5]  }
  0x1d   :  { %435 = vmatprep.subr.bf16.mxu0 %v500_v27  ;;  %s391_s3 = sshll.u32 %s503_s2, 4  ;;  %s392_s3 = int_to_ptr.vmem [resolvable:$true] %s391_s3 }
  0x1e   :  { %70 = vadd.xlane.f32.xlu1 %v69_v16  ;;  %s471_s4 = scalar_lea.vmem %s392_s3, 2048  ;;  %p476_p9 = scmp.lt.s32.totalorder %s392_s3, %s392_s3 }
  0x1f   :  { %58 = vadd.xlane.f32.xlu0 %v57_v17  ;;  %p472_p8 = scmp.ne.s32.totalorder %s392_s3, %s471_s4  ;;  %p477_p10 = scmp.lt.s32.totalorder %s471_s4, %s471_s4 }
  0x20   :  { %437 = vmatpush3.bf16.msra.mxu0 %v436_v30 }
  0x21   :  { %p478_p11 = por %p477_p10, %p476_p9 }
  0x22   :  { %73 = vadd.xlane.f32.xlu1 %v72_v22 }
  0x23   :  { %61 = vadd.xlane.f32.xlu0 %v60_v23  ;;  %p479_p12 = pnand %p478_p11, %p472_p8 }
  0xa3   :  { %v65_v33 = vpop.xlane.xlu1 %64 }
  0xa4   :  { %v53_v35 = vpop.xlane.xlu0 %52  ;;  %v79_v48 = vmul.f32 0.00390625, %v65_v33 }
  0xa5   :  { %v75_v51 = vmul.f32 0.00390625, %v53_v35 }
  0xa6   :  { %v132_v58 = vrot.slane %v79_v48, %v106_v47 }
  0xa7   :  { %v68_v37 = vpop.xlane.xlu1 %67  ;;  %v107_v62 = vrot.slane %v75_v51, %v106_v47 }
  0xa8   :  { %v56_v40 = vpop.xlane.xlu0 %55  ;;  %v80_v42 = vmul.f32 0.00390625, %v68_v37 }
  0xa9   :  { %v76_v44 = vmul.f32 0.00390625, %v56_v40 }
  0xaa   :  { %v136_v53 = vrot.slane %v80_v42, %v111_v41  ;;  %v337_v42 = vsub.s32 1, %v609_v39 }
  0xab   :  { %v71_v46 = vpop.xlane.xlu1 %70  ;;  %v112_v55 = vrot.slane %v76_v44, %v111_v41 }
  0xac   :  { %v81_v49 = vmul.f32 0.00390625, %v71_v46  ;;  %v59_v50 = vpop.xlane.xlu0 %58  ;;  %v137_v3 = vsel %vm113_vm1, %v136_v53, %v132_v58 }
  0xad   :  { %v77_v52 = vmul.f32 0.00390625, %v59_v50  ;;  %v114_v10 = vsel %vm113_vm1, %v112_v55, %v107_v62 }
  0xae   :  { %v141_v56 = vrot.slane %v81_v49, %v118_v45 }
  0xaf   :  { %v74_v57 = vpop.xlane.xlu1 %73  ;;  %v119_v59 = vrot.slane %v77_v52, %v118_v45 }
  0xb0   :  { %v82_v60 = vmul.f32 0.00390625, %v74_v57  ;;  %v62_v61 = vpop.xlane.xlu0 %61  ;;  %v142_v11 = vsel %vm120_vm2, %v141_v56, %v137_v3 }
  0xb1   :  { %v78_v63 = vmul.f32 0.00390625, %v62_v61  ;;  %v121_v17 = vsel %vm120_vm2, %v119_v59, %v114_v10 }
  0xb2   :  { %v146_v7 = vrot.slane %v82_v60, %v125_v54 }
  0xb3   :  { %v126_v16 = vrot.slane %v78_v63, %v125_v54 }
  0xb4   :  { %v147_v22 = vsel %vm127_vm3, %v146_v7, %v142_v11 }
  0xb5   :  { %v128_v23 = vsel %vm127_vm3, %v126_v16, %v121_v17 }
  0xb6   :  { %v149_v24 = vsel %vm148_vm4, %v147_v22, %v128_v23 }
  0xb7   :  { %425 = vmatmul.mubr.msk.f32.vlgmr.msra.gmra.mrb[0].mxu0 %vm150_vm5, %v149_v24 }
 0x18a   :  { %v219_v27 = vpop.f32.mrb[0].mxu0 }
 0x18b   :  { %v220_v28 = vadd.f32 %v403_v26, %v219_v27  ;;  %v426_v29 = vpop.f32.mrb[1].mxu0 }
 0x18d   :  { %v223_v30 = vmax.f32 %v220_v28, 0.0 }
 0x18f   :  { %430 = vmatmul.mubr.msk.f32.vlgmr.msra.gmra.mrb[0].mxu1 %vm232_vm7, %v223_v30 }
 0x262   :  { %v306_v32 = vpop.f32.mrb[0].mxu1 }
 0x263   :  { %v307_v33 = vadd.f32 %v405_v31, %v306_v32  ;;  %v431_v34 = vpop.f32.mrb[1].mxu1 }
 0x265   :  { %v408_v35 = vmul.f32 -1.442695, %v307_v33 }
 0x267   :  { %445 = vpow2.f32 %v408_v35 }
 0x271   :  { %v446_v36 = vpop.eup %445 }
 0x272   :  { %v313_v37 = vadd.f32 1.0, %v446_v36 }
 0x274   :  { %447 = vrcp.f32 %v313_v37 }
 0x27e   :  { %v448_v40 = vpop.eup %447 }
 0x27f   :  { %v319_v41 = vrot.slane %v448_v40, %v318_v38  ;;  %v338_v43 = vrot.slane %v448_v40, %v337_v42 }
 0x281   :  { %325 = vbcast.lane.b32.xlu1 %v319_v41, 264  ;;  %321 = vbcast.lane.b32.xlu0 %v319_v41, 256 }
 0x285   :  { %329 = vbcast.lane.b32.xlu1 %v319_v41, 272  ;;  %340 = vbcast.lane.b32.xlu0 %v338_v43, 256 }
 0x289   :  { %333 = vbcast.lane.b32.xlu1 %v319_v41, 280  ;;  %348 = vbcast.lane.b32.xlu0 %v338_v43, 272 }
 0x28d   :  { %344 = vbcast.lane.b32.xlu1 %v338_v43, 264 }
 0x291   :  { %352 = vbcast.lane.b32.xlu1 %v338_v43, 280 }
 0x2f3   :  { %v326_v44 = vpop.permute.xlu1 %325  ;;  %v322_v45 = vpop.permute.xlu0 %321 }
 0x2f4   :  { %v356_v46 = vmul.f32 %v326_v44, %v565_v8  ;;  %v357_v47 = vmul.f32 %v326_v44, %v567_v9  ;;  %v354_v48 = vmul.f32 %v322_v45, %v553_v2  ;;  %v355_v49 = vmul.f32 %v322_v45, %v557_v4 }
 0x2f6   :  { %372 = vst [vmem:[#allocation5 + $0x10] sm:$0xff] %v356_v46  ;;  %373 = vst [vmem:[#allocation5 + $0x18] sm:$0xff] %v357_v47 }
 0x2f7   :  { %370 = vst [vmem:[#allocation5] sm:$0xff] %v354_v48  ;;  %371 = vst [vmem:[#allocation5 + $0x8] sm:$0xff] %v355_v49  ;;  %v330_v39 = vpop.permute.xlu1 %329  ;;  %v341_v50 = vpop.permute.xlu0 %340 }
 0x2f8   :  { %v358_v51 = vmul.f32 %v330_v39, %v577_v14  ;;  %v359_v52 = vmul.f32 %v330_v39, %v579_v15  ;;  %v362_v53 = vmul.f32 %v341_v50, %v549_v0  ;;  %v363_v8 = vmul.f32 %v341_v50, %v551_v1 }
 0x2fa   :  { %374 = vst [vmem:[#allocation5 + $0x20] sm:$0xff] %v358_v51  ;;  %375 = vst [vmem:[#allocation5 + $0x28] sm:$0xff] %v359_v52 }
 0x2fb   :  { %378 = vst [vmem:[#allocation5 + $0x40] sm:$0xff] %v362_v53  ;;  %379 = vst [vmem:[#allocation5 + $0x48] sm:$0xff] %v363_v8  ;;  %v334_v2 = vpop.permute.xlu1 %333  ;;  %v349_v4 = vpop.permute.xlu0 %348 }
 0x2fc   :  { %v360_v9 = vmul.f32 %v334_v2, %v589_v20  ;;  %v361_v54 = vmul.f32 %v334_v2, %v591_v21  ;;  %v366_v55 = vmul.f32 %v349_v4, %v573_v12  ;;  %v367_v14 = vmul.f32 %v349_v4, %v575_v13 }
 0x2fe   :  { %376 = vst [vmem:[#allocation5 + $0x30] sm:$0xff] %v360_v9  ;;  %377 = vst [vmem:[#allocation5 + $0x38] sm:$0xff] %v361_v54 }
 0x2ff   :  { %382 = vst [vmem:[#allocation5 + $0x60] sm:$0xff] %v366_v55  ;;  %383 = vst [vmem:[#allocation5 + $0x68] sm:$0xff] %v367_v14  ;;  %v345_v0 = vpop.permute.xlu1 %344 }
 0x300   :  { %v364_v1 = vmul.f32 %v345_v0, %v559_v5  ;;  %v365_v15 = vmul.f32 %v345_v0, %v561_v6 }
 0x302   :  { %380 = vst [vmem:[#allocation5 + $0x50] sm:$0xff] %v364_v1  ;;  %381 = vst [vmem:[#allocation5 + $0x58] sm:$0xff] %v365_v15 }
 0x303   :  { %v353_v20 = vpop.permute.xlu1 %352 }
 0x304   :  { %v368_v21 = vmul.f32 %v353_v20, %v585_v18  ;;  %v369_v12 = vmul.f32 %v353_v20, %v587_v19 }
 0x306   :  { %384 = vst [vmem:[#allocation5 + $0x70] sm:$0xff] %v368_v21  ;;  %385 = vst [vmem:[#allocation5 + $0x78] sm:$0xff] %v369_v12 }
 0x307   :  { %482 = shalt.err (!%p479_p12)
}
 0x308   :  { %s483_s21 = scalar_lea.hbm %s662_s5, 2048 }
 0x309   :  { %p484_p13 = scmp.ne.s32.totalorder %s662_s5, %s483_s21  ;;  %p487_p0 = scmp.lt.u32.totalorder %s483_s21, %s662_s5 }
 0x30b   :  { %p489_p1 = pnand %p487_p0, %p484_p13 }
 0x30d   :  { %492 = shalt.err (!%p489_p1)
}
 0x30e   :  { %397 = dma.vmem_to_hbm [thread:$0]  %s392_s3, 2048, %s662_s5, [#allocation4], %s498_s28, %s498_s28, %s499_s29  }
 0x30f   :  { %495 = dma.done.wait [#allocation4], 2048  }
 0x310   :  { %496 = vsyncadd [#allocation4], 4294965248 }
 0x311   :  { %401 = vsyncpa [#allocation3], 1 }
 0x312   :  { %402 = vsyncpa [#allocation4], 1 }

</bundles_post_ra>
